<compile_context>
chip_gen: v6e
topology: v6e:2x2x1
jax: 0.10.0
libtpu: 0.0.40
codegen_flags: <defaults>
</compile_context>

<pallas_src>
import functools

import jax
import jax.numpy as jnp
from jax.experimental import pallas as pl
from jax.experimental.pallas import tpu as pltpu


def _round_up(x, m):
    return (x + m - 1) // m * m


def _choose_tile(n_batch, tm):
    """Pick the batch-tile size (rows per grid step).

    Returns (tm_eff, m_padded) with tm_eff a multiple of 16 (bf16 sublane
    packing), m_padded a multiple of tm_eff, and >= 2 grid steps whenever the
    batch is large enough (v7x megacore sharding), while keeping row padding
    minimal by splitting the batch nearly evenly.
    """
    n16 = _round_up(max(n_batch, 16), 16)
    if n16 <= tm:
        # Whole batch would fit in one tile; split in two (when big enough) so
        # v7x's second TensorCore is not idle.  No effect on v5e/v6e (1 TC).
        steps = 2 if n_batch > 16 else 1
    else:
        steps = pl.cdiv(n16, _round_up(tm, 16))
    tm_eff = _round_up(pl.cdiv(n16, steps), 16)
    m_padded = _round_up(n16, tm_eff)
    return tm_eff, m_padded


def _vmem_budget(tm_eff, n_feat, h1p, h21p, n_cls_p, param_bytes):
    """Explicit VMEM budget from the actual footprint (v7x-safe <= 64 MiB)."""
    x_tile = tm_eff * n_feat * 4          # f32 activation tile
    out_tile = tm_eff * n_cls_p * 2       # bf16 output tile
    # f32 intermediates + their bf16 MXU copies + bf16 copy of x.
    inter = tm_eff * (h1p + h21p) * (4 + 2) + tm_eff * n_feat * 2
    total = 2 * (x_tile + out_tile) + 2 * param_bytes + inter
    total = int(total * 1.5) + (2 << 20)  # 50% + 2 MiB headroom for the compiler
    return max(4 << 20, min(_round_up(total, 1 << 20), 64 << 20))


def _fcnet_kernel(x_ref, w1_ref, b1_ref, w21_ref, b21_ref, w31_ref, b31_ref,
                  out_ref):
    """Fused 3-layer MLP on one TM-row batch tile: relu(fc1)->relu(fc21)->fc31."""
    # x arrives as f32; cast to bf16 on the VPU (wrapper-side cast removed).
    x = x_ref[...].astype(jnp.bfloat16)

    h1 = jnp.dot(x, w1_ref[...], preferred_element_type=jnp.float32)
    h1 = jnp.maximum(h1 + b1_ref[...], 0.0)

    h2 = jnp.dot(h1.astype(jnp.bfloat16), w21_ref[...],
                 preferred_element_type=jnp.float32)
    h2 = jnp.maximum(h2 + b21_ref[...], 0.0)

    h3 = jnp.dot(h2.astype(jnp.bfloat16), w31_ref[...],
                 preferred_element_type=jnp.float32)
    # bf16 store: lane-dense vst, half the HBM writeback of f32.
    out_ref[...] = (h3 + b31_ref[...]).astype(out_ref.dtype)


@functools.partial(jax.jit, static_argnames=("n_cls", "tm"))
def fcnet_forward(x, sgn, padded_params, n_cls, tm=4096):
    """Pallas-backed FCNet.forward. `sgn` is unused (as in the reference)."""
    del sgn
    w1, b1, w21, b21, w31, b31 = padded_params  # lane-padded; w* bf16, b* f32
    n_batch = x.shape[0]
    x2d = x.reshape(n_batch, -1)  # x.view(nBatch, -1); stays f32 (cast in-kernel)
    n_feat = x2d.shape[1]
    h1p, h21p, n_cls_p = w1.shape[1], w21.shape[1], w31.shape[1]

    tm_eff, m_padded = _choose_tile(n_batch, tm)
    if m_padded != n_batch:
        # Padded rows compute relu(bias)-garbage in the kernel; they are sliced
        # off below and must never be read by a consumer.
        x2d = jnp.pad(x2d, ((0, m_padded - n_batch), (0, 0)))
    grid = (m_padded // tm_eff,)

    param_bytes = sum(int(a.size) * a.dtype.itemsize for a in padded_params)
    cost = pl.CostEstimate(
        flops=2 * m_padded * (n_feat * h1p + h1p * h21p + h21p * n_cls_p),
        transcendentals=0,
        bytes_accessed=(m_padded * n_feat * 4          # x read (f32)
                        + param_bytes                  # weights/biases
                        + m_padded * n_cls_p * 2),     # out write (bf16)
    )

    out = pl.pallas_call(
        _fcnet_kernel,
        out_shape=jax.ShapeDtypeStruct((m_padded, n_cls_p), jnp.bfloat16),
        grid_spec=pl.GridSpec(
            grid=grid,
            in_specs=[
                # Activations: one TM-row tile per grid step (pipelined).
                pl.BlockSpec((tm_eff, n_feat), lambda i: (i, 0)),
                # Weights/biases: constant block index -> VMEM-resident,
                # never re-DMA'd per grid step.
                pl.BlockSpec(w1.shape, lambda i: (0, 0)),
                pl.BlockSpec(b1.shape, lambda i: (0, 0)),
                pl.BlockSpec(w21.shape, lambda i: (0, 0)),
                pl.BlockSpec(b21.shape, lambda i: (0, 0)),
                pl.BlockSpec(w31.shape, lambda i: (0, 0)),
                pl.BlockSpec(b31.shape, lambda i: (0, 0)),
            ],
            out_specs=pl.BlockSpec((tm_eff, n_cls_p), lambda i: (i, 0)),
        ),
        compiler_params=pltpu.CompilerParams(
            # Batch tiles are independent -> megacore-shardable on v7x.
            dimension_semantics=("parallel",),
            vmem_limit_bytes=_vmem_budget(tm_eff, n_feat, h1p, h21p, n_cls_p,
                                          param_bytes),
        ),
        cost_estimate=cost,
    )(x2d, w1, b1, w21, b21, w31, b31)

    # Strip batch padding and the zero-padded output lanes; upcast bf16 -> f32.
    return out[:n_batch, :n_cls].astype(jnp.float32)


def init_fcnet_params(key, nFeatures, nHidden1, nHidden21, nCls):
    """Deterministic init mimicking nn.Linear (uniform +-1/sqrt(fan_in)).

    Weights are stored transposed, i.e. shape (in, out); biases as (1, out).
    """
    ks = jax.random.split(key, 6)

    def linear(kw, kb, fan_in, fan_out):
        bound = 1.0 / jnp.sqrt(fan_in)
        w = jax.random.uniform(kw, (fan_in, fan_out), jnp.float32,
                               minval=-bound, maxval=bound)
        b = jax.random.uniform(kb, (1, fan_out), jnp.float32,
                               minval=-bound, maxval=bound)
        return w, b

    w1, b1 = linear(ks[0], ks[1], nFeatures, nHidden1)
    w21, b21 = linear(ks[2], ks[3], nHidden1, nHidden21)
    w31, b31 = linear(ks[4], ks[5], nHidden21, nCls)
    return (w1, b1, w21, b21, w31, b31)


def prepare_params(raw_params, lane=128):
    """Zero-pad hidden/output widths to multiples of `lane`; cast weights to bf16.

    Padded weight columns and bias entries are zero, so ReLU keeps the padded
    activations at zero and results are unchanged after slicing the output.
    The contraction dim (nFeatures) is intentionally NOT padded.
    """
    w1, b1, w21, b21, w31, b31 = raw_params

    def pad2(a, rows, cols):
        return jnp.pad(a, ((0, rows - a.shape[0]), (0, cols - a.shape[1])))

    h1p = _round_up(w1.shape[1], lane)
    h21p = _round_up(w21.shape[1], lane)
    clsp = _round_up(w31.shape[1], lane)

    w1p = pad2(w1, w1.shape[0], h1p).astype(jnp.bfloat16)
    b1p = pad2(b1, 1, h1p).astype(jnp.float32)
    w21p = pad2(w21, h1p, h21p).astype(jnp.bfloat16)
    b21p = pad2(b21, 1, h21p).astype(jnp.float32)
    w31p = pad2(w31, h21p, clsp).astype(jnp.bfloat16)
    b31p = pad2(b31, 1, clsp).astype(jnp.float32)
    return (w1p, b1p, w21p, b21p, w31p, b31p)


def fcnet_reference(x, raw_params, matmul_dtype=jnp.float32):
    """Plain-JAX reference of the same forward pass (bn=False)."""
    w1, b1, w21, b21, w31, b31 = raw_params
    x2d = x.reshape(x.shape[0], -1)

    def mm(a, w):
        return jnp.dot(a.astype(matmul_dtype), w.astype(matmul_dtype),
                       preferred_element_type=jnp.float32)

    h1 = jnp.maximum(mm(x2d, w1) + b1, 0.0)
    h2 = jnp.maximum(mm(h1, w21) + b21, 0.0)
    return mm(h2, w31) + b31


if __name__ == "__main__":
    # Small shapes consistent with the module: nFeatures, nHidden1, nHidden21, nCls.
    # nBatch=20 is not a multiple of 16 -> exercises padding + a 2-step grid.
    nBatch, nFeatures, nHidden1, nHidden21, nCls = 20, 32, 32, 32, 8

    key = jax.random.PRNGKey(0)
    kx, kp = jax.random.split(key)

    x = jax.random.normal(kx, (nBatch, nFeatures), jnp.float32)
    sgn = jnp.ones((nBatch,), jnp.float32)  # unused by forward, as in PyTorch

    raw_params = init_fcnet_params(kp, nFeatures, nHidden1, nHidden21, nCls)
    params = prepare_params(raw_params)

    out = fcnet_forward(x, sgn, params, n_cls=nCls)
    out = jax.block_until_ready(out)
    assert out.shape == (nBatch, nCls)

    # Reference with bf16 matmul inputs / f32 accumulation (kernel additionally
    # rounds its output through bf16 on the store, hence the 1e-2 tolerance).
    ref_bf16 = fcnet_reference(x, raw_params, matmul_dtype=jnp.bfloat16)
    assert jnp.allclose(out, ref_bf16, atol=1e-2, rtol=1e-2), "mismatch vs bf16 reference"

    # Sanity vs full-f32 reference with tolerance loosened for bf16 MXU inputs.
    ref_f32 = fcnet_reference(x, raw_params, matmul_dtype=jnp.float32)
    assert jnp.allclose(out, ref_f32, atol=5e-2, rtol=5e-2), "mismatch vs f32 reference"

    # Second shape: batch divisible by 16 -> exercises the no-padding path
    # (still a 2-step grid so v7x megacore has work for both cores).
    nBatch2 = 64
    x2 = jax.random.normal(jax.random.PRNGKey(1), (nBatch2, nFeatures), jnp.float32)
    out2 = jax.block_until_ready(
        fcnet_forward(x2, jnp.ones((nBatch2,), jnp.float32), params, n_cls=nCls))
    ref2 = fcnet_reference(x2, raw_params, matmul_dtype=jnp.bfloat16)
    assert out2.shape == (nBatch2, nCls)
    assert jnp.allclose(out2, ref2, atol=1e-2, rtol=1e-2), "mismatch on batch=64"

    print("KERNEL_OK")
</pallas_src>

<mosaic_0001>
module attributes {stable_mosaic.version = 11 : i64} {
  func.func @_fcnet_kernel(%arg0: i32, %arg1: memref<16x32xf32, #tpu.memory_space<vmem>>, %arg2: memref<32x128xbf16, #tpu.memory_space<vmem>>, %arg3: memref<1x128xf32, #tpu.memory_space<vmem>>, %arg4: memref<128x128xbf16, #tpu.memory_space<vmem>>, %arg5: memref<1x128xf32, #tpu.memory_space<vmem>>, %arg6: memref<128x128xbf16, #tpu.memory_space<vmem>>, %arg7: memref<1x128xf32, #tpu.memory_space<vmem>>, %arg8: memref<16x128xbf16, #tpu.memory_space<vmem>>) attributes {dimension_semantics = [#tpu.dimension_semantics<parallel>], iteration_bounds = array<i64: 2>, scalar_prefetch = 0 : i64, scratch_operands = 0 : i64, tpu.core_type = #tpu.core_type<tc>, window_params = [{transform_indices = @transform_0, window_bounds = array<i64: 16, 32>}, {pipeline_mode = #tpu.pipeline_mode<synchronous>, transform_indices = @transform_1, window_bounds = array<i64: 32, 128>}, {pipeline_mode = #tpu.pipeline_mode<synchronous>, transform_indices = @transform_2, window_bounds = array<i64: 1, 128>}, {pipeline_mode = #tpu.pipeline_mode<synchronous>, transform_indices = @transform_3, window_bounds = array<i64: 128, 128>}, {pipeline_mode = #tpu.pipeline_mode<synchronous>, transform_indices = @transform_4, window_bounds = array<i64: 1, 128>}, {pipeline_mode = #tpu.pipeline_mode<synchronous>, transform_indices = @transform_5, window_bounds = array<i64: 128, 128>}, {pipeline_mode = #tpu.pipeline_mode<synchronous>, transform_indices = @transform_6, window_bounds = array<i64: 1, 128>}, {transform_indices = @transform_7, window_bounds = array<i64: 16, 128>}]} {
    %c0 = arith.constant 0 : index
    %c0_0 = arith.constant 0 : index
    %0 = vector.load %arg1[%c0, %c0_0] : memref<16x32xf32, #tpu.memory_space<vmem>>, vector<16x32xf32>
    %1 = arith.truncf %0 : vector<16x32xf32> to vector<16x32xbf16>
    %c0_1 = arith.constant 0 : index
    %c0_2 = arith.constant 0 : index
    %2 = vector.load %arg2[%c0_1, %c0_2] : memref<32x128xbf16, #tpu.memory_space<vmem>>, vector<32x128xbf16>
    %cst = arith.constant dense<0.000000e+00> : vector<16x128xf32>
    %3 = tpu.matmul %1, %2, %cst {dimension_numbers = #tpu.dot_dimension_numbers<[1], [0], [0], [1], [0, 0, 1, 1], [], []>} : vector<16x32xbf16>, vector<32x128xbf16>, vector<16x128xf32> -> vector<16x128xf32>
    %c0_3 = arith.constant 0 : index
    %c0_4 = arith.constant 0 : index
    %4 = vector.load %arg3[%c0_3, %c0_4] : memref<1x128xf32, #tpu.memory_space<vmem>>, vector<1x128xf32>
    %5 = vector.broadcast %4 : vector<1x128xf32> to vector<16x128xf32>
    %6 = arith.addf %3, %5 : vector<16x128xf32>
    %cst_5 = arith.constant 0.000000e+00 : f32
    %7 = vector.broadcast %cst_5 : f32 to vector<16x128xf32>
    %8 = arith.maximumf %6, %7 : vector<16x128xf32>
    %9 = arith.truncf %8 : vector<16x128xf32> to vector<16x128xbf16>
    %c0_6 = arith.constant 0 : index
    %c0_7 = arith.constant 0 : index
    %10 = vector.load %arg4[%c0_6, %c0_7] : memref<128x128xbf16, #tpu.memory_space<vmem>>, vector<128x128xbf16>
    %cst_8 = arith.constant dense<0.000000e+00> : vector<16x128xf32>
    %11 = tpu.matmul %9, %10, %cst_8 {dimension_numbers = #tpu.dot_dimension_numbers<[1], [0], [0], [1], [0, 0, 1, 1], [], []>} : vector<16x128xbf16>, vector<128x128xbf16>, vector<16x128xf32> -> vector<16x128xf32>
    %c0_9 = arith.constant 0 : index
    %c0_10 = arith.constant 0 : index
    %12 = vector.load %arg5[%c0_9, %c0_10] : memref<1x128xf32, #tpu.memory_space<vmem>>, vector<1x128xf32>
    %13 = vector.broadcast %12 : vector<1x128xf32> to vector<16x128xf32>
    %14 = arith.addf %11, %13 : vector<16x128xf32>
    %cst_11 = arith.constant 0.000000e+00 : f32
    %15 = vector.broadcast %cst_11 : f32 to vector<16x128xf32>
    %16 = arith.maximumf %14, %15 : vector<16x128xf32>
    %17 = arith.truncf %16 : vector<16x128xf32> to vector<16x128xbf16>
    %c0_12 = arith.constant 0 : index
    %c0_13 = arith.constant 0 : index
    %18 = vector.load %arg6[%c0_12, %c0_13] : memref<128x128xbf16, #tpu.memory_space<vmem>>, vector<128x128xbf16>
    %cst_14 = arith.constant dense<0.000000e+00> : vector<16x128xf32>
    %19 = tpu.matmul %17, %18, %cst_14 {dimension_numbers = #tpu.dot_dimension_numbers<[1], [0], [0], [1], [0, 0, 1, 1], [], []>} : vector<16x128xbf16>, vector<128x128xbf16>, vector<16x128xf32> -> vector<16x128xf32>
    %c0_15 = arith.constant 0 : index
    %c0_16 = arith.constant 0 : index
    %20 = vector.load %arg7[%c0_15, %c0_16] : memref<1x128xf32, #tpu.memory_space<vmem>>, vector<1x128xf32>
    %21 = vector.broadcast %20 : vector<1x128xf32> to vector<16x128xf32>
    %22 = arith.addf %19, %21 : vector<16x128xf32>
    %23 = arith.truncf %22 : vector<16x128xf32> to vector<16x128xbf16>
    %c0_17 = arith.constant 0 : index
    %c0_18 = arith.constant 0 : index
    %24 = vector.load %arg8[%c0_17, %c0_18] : memref<16x128xbf16, #tpu.memory_space<vmem>>, vector<16x128xbf16>
    tpu.vector_store %arg8[%c0_17, %c0_18], %23 {strides = array<i32>} : memref<16x128xbf16, #tpu.memory_space<vmem>>, vector<16x128xbf16>,
    return
  }
  func.func @transform_0(%arg0: i32) -> (i32, i32) {
    %c0_i32 = arith.constant 0 : i32
    %c0_i32_0 = arith.constant 0 : i32
    return %arg0, %c0_i32 : i32, i32
  }
  func.func @transform_1(%arg0: i32) -> (i32, i32) {
    %c0_i32 = arith.constant 0 : i32
    %c0_i32_0 = arith.constant 0 : i32
    %c0_i32_1 = arith.constant 0 : i32
    return %c0_i32, %c0_i32_0 : i32, i32
  }
  func.func @transform_2(%arg0: i32) -> (i32, i32) {
    %c0_i32 = arith.constant 0 : i32
    %c0_i32_0 = arith.constant 0 : i32
    %c0_i32_1 = arith.constant 0 : i32
    return %c0_i32, %c0_i32_0 : i32, i32
  }
  func.func @transform_3(%arg0: i32) -> (i32, i32) {
    %c0_i32 = arith.constant 0 : i32
    %c0_i32_0 = arith.constant 0 : i32
    %c0_i32_1 = arith.constant 0 : i32
    return %c0_i32, %c0_i32_0 : i32, i32
  }
  func.func @transform_4(%arg0: i32) -> (i32, i32) {
    %c0_i32 = arith.constant 0 : i32
    %c0_i32_0 = arith.constant 0 : i32
    %c0_i32_1 = arith.constant 0 : i32
    return %c0_i32, %c0_i32_0 : i32, i32
  }
  func.func @transform_5(%arg0: i32) -> (i32, i32) {
    %c0_i32 = arith.constant 0 : i32
    %c0_i32_0 = arith.constant 0 : i32
    %c0_i32_1 = arith.constant 0 : i32
    return %c0_i32, %c0_i32_0 : i32, i32
  }
  func.func @transform_6(%arg0: i32) -> (i32, i32) {
    %c0_i32 = arith.constant 0 : i32
    %c0_i32_0 = arith.constant 0 : i32
    %c0_i32_1 = arith.constant 0 : i32
    return %c0_i32, %c0_i32_0 : i32, i32
  }
  func.func @transform_7(%arg0: i32) -> (i32, i32) {
    %c0_i32 = arith.constant 0 : i32
    %c0_i32_0 = arith.constant 0 : i32
    return %arg0, %c0_i32 : i32, i32
  }
}

</mosaic_0001>

<bundles_post_ra>
// kernel: fcnet_forward.1
= control target key start
LH: loop header
LB: loop body
LE: loop exit
PB: predicated region body
PF: predicated region fallthrough
CT: control target
= control target key end

     0   :  { %12 = vsyncpa [#allocation3], 0  ;;  %s1108_s0 = inlined_call_operand.vmem [shape: f32[32,32], index: 0, kind: input, shape index: {}]   ;;  %s1109_s1 = inlined_call_operand.hbm [shape: bf16[32,128], index: 1, kind: input, shape index: {}]   ;;  %s1110_s2 = inlined_call_operand.vmem [shape: f32[1,128], index: 2, kind: input, shape index: {}]   ;;  %s1111_s3 = inlined_call_operand.hbm [shape: bf16[128,128], index: 3, kind: input, shape index: {}]   ;;  %s1112_s4 = inlined_call_operand.vmem [shape: f32[1,128], index: 4, kind: input, shape index: {}]   ;;  %s1113_s5 = inlined_call_operand.vmem [shape: bf16[128,128], index: 5, kind: input, shape index: {}]   ;;  %s1114_s6 = inlined_call_operand.vmem [shape: f32[1,128], index: 6, kind: input, shape index: {}]   ;;  %s1115_s7 = inlined_call_operand.vmem [shape: bf16[32,128], index: 7, kind: output, shape index: {}]  }
   0x1   :  { %13 = vsyncpa [#allocation5], 0  ;;  %s982_s24 = smov 0  }
   0x2 LB: > { %s702_s25 = sadd.s32 4294967295, %s934_s24   ;;  %p704_p0 = scmp.ge.s32.totalorder %s934_s24, 1  ;;  %s934_s24 = sphi %s982_s24, %s19_s24  }
   0x3   : > { %p202_p1 = scmp.lt.s32.totalorder %s934_s24, 3  ;;  %s936_s26 = smov [#allocation2]  }
   0x4   : > { %s214_s27 = sshll.u32 %s936_s26, 4  ;;  %p996_p3 = scmp.eq.s32.totalorder %s702_s25, 0  ;;  %s215_s27 = int_to_ptr.vmem [resolvable:$true] %s214_s27 }
   0x5   : > { %p990_p2 = pnand %p704_p0, %p202_p1  ;;  %s937_s30 = smov [#allocation4]  }
   0x6   : > { %s230_s8 = sshll.u32 %s937_s30, 4  ;;  %s879_s10 = scalar_lea.vmem %s215_s27, 256  ;;  %s231_s8 = int_to_ptr.vmem [resolvable:$true] %s230_s8 }
   0x7   : > { %p825_p4 = pneg %p990_p2  ;;  %p880_p7 = scmp.ne.s32.totalorder %s215_s27, %s879_s10 }
   0x8   : > { %p887_p10 = scmp.lt.s32.totalorder %s215_s27, %s215_s27  ;;  %p888_p11 = scmp.lt.s32.totalorder %s879_s10, %s879_s10 }
   0x9   : > { %p1004_p5 = pnand %p996_p3, %p825_p4 }
   0xa   : > { %p889_p12 = por %p888_p11, %p887_p10 }
   0xb   : > { %p870_p6 = pneg %p1004_p5 }
   0xd   : > { %p882_p8 = pnand %p880_p7, %p870_p6 }
   0xf   : > { %p883_p9 = pneg %p882_p8 }
  0x11   : > { %p890_p13 = pnand %p889_p12, %p883_p9 }
  0x13   : > { %893 = shalt.err (!%p890_p13)
}
  0x14   : > { %s938_s11 = smov 64   ;;  %s939_s12 = smov 4  }
  0x15   : > { %828 = dma.hbm_to_vmem [thread:$0]  (!%p1004_p5), %s1109_s1, 256, %s215_s27, [#allocation3], %s938_s11, %s938_s11, %s939_s12  }
  0x16   : > { %s905_s15 = scalar_lea.vmem %s231_s8, 1024  ;;  %p913_p7 = scmp.lt.s32.totalorder %s231_s8, %s231_s8 }
  0x17   : > { %p906_p0 = scmp.ne.s32.totalorder %s231_s8, %s905_s15  ;;  %p914_p8 = scmp.lt.s32.totalorder %s905_s15, %s905_s15 }
  0x19   : > { %p908_p1 = pnand %p906_p0, %p870_p6  ;;  %p915_p10 = por %p914_p8, %p913_p7 }
  0x1b   : > { %p909_p4 = pneg %p908_p1 }
  0x1d   : > { %p916_p9 = pnand %p915_p10, %p909_p4 }
  0x1f   : > { %919 = shalt.err (!%p916_p9)
}
  0x20   : > { %831 = dma.hbm_to_vmem [thread:$0]  (!%p1004_p5), %s1111_s3, 1024, %s231_s8, [#allocation5], %s938_s11, %s938_s11, %s939_s12  }
  0x21   : > { %264 = sbr.rel (%p990_p2) target bundleno = 659 (0x293), region = 48 }
  0x26   : > { %925 = dma.done.wait (%p996_p3), [#allocation3], 256  }
  0x27   : > { %927 = vsyncadd (%p996_p3), [#allocation3], 4294967040 }
  0x28   : > { %929 = dma.done.wait (%p996_p3), [#allocation5], 1024  }
  0x29   : > { %931 = vsyncadd (%p996_p3), [#allocation5], 4294966272  ;;  %s711_s18 = sshll.u32 %s702_s25, 1  ;;  %v940_v0 = vmov 0.0   ;;  %vm941_vm0 = vmmov 0   ;;  %v850_v1 = vld [vmem:[#allocation2 + $0x8] sm:$0xff]  }
  0x2a   : > { %769 = vmatprep.subr.bf16.mxu0 %v940_v0  ;;  %773 = vmatprep.mubr.msk.bf16.mxu0 %vm941_vm0, %v940_v0  ;;  %p301_p2 = scmp.lt.s32.totalorder %s711_s18, 3  ;;  %v851_v2 = vld [vmem:[#allocation2] sm:$0xff]   ;;  %v852_v5 = vld [vmem:[#allocation4 + $0x38] sm:$0xff]   ;;  %vm339_vm1 = vcmask 261120   ;;  %v854_v8 = vld [vmem:[#allocation4 + $0x28] sm:$0xff]  }
  0x2b   : > { %777 = vmatprep.subr.bf16.mxu1 %v940_v0  ;;  %793 = vmatprep.mubr.msk.bf16.mxu1 %vm941_vm0, %v940_v0  ;;  %v853_v7 = vld [vmem:[#allocation4 + $0x30] sm:$0xff]   ;;  %v855_v9 = vld [vmem:[#allocation4 + $0x20] sm:$0xff]   ;;  %v856_v10 = vld [vmem:[#allocation4 + $0x18] sm:$0xff]  }
  0x2c   : > { %s1120_s18 = smov (!%p301_p2, %s711_s18), 3  ;;  %770 = vmatpush3.bf16.msra.mxu0 %v850_v1  ;;  %778 = vmatpush3.bf16.msra.mxu1 %v852_v5  ;;  %v857_v11 = vld [vmem:[#allocation4 + $0x10] sm:$0xff]   ;;  %v858_v12 = vld [vmem:[#allocation4 + $0x8] sm:$0xff]   ;;  %v859_v13 = vld [vmem:[#allocation4] sm:$0xff]  }
  0x2d   : > { %s712_s19 = sshll.u32 %s1120_s18, 3  ;;  %771 = vmatprep.subr.bf16.mxu0 %v940_v0  ;;  %779 = vmatprep.subr.bf16.mxu1 %v940_v0  ;;  %v860_v14 = vld [vmem:[%s1113_s5 + $0x38] sm:$0xff]   ;;  %v861_v15 = vld [vmem:[%s1113_s5 + $0x30] sm:$0xff]   ;;  %v862_v16 = vld [vmem:[%s1113_s5 + $0x28] sm:$0xff]   ;;  %s714_s25 = sshll.u32 %s1120_s18, 2 }
  0x2e   : > { %s304_s22 = scalar_lea.vmem %s1108_s0, %s712_s19  ;;  %v863_v17 = vld [vmem:[%s1113_s5 + $0x20] sm:$0xff]   ;;  %v864_v18 = vld [vmem:[%s1113_s5 + $0x18] sm:$0xff]   ;;  %v865_v29 = vld [vmem:[%s1113_s5 + $0x10] sm:$0xff]   ;;  %s310_s28 = scalar_lea.vmem %s1115_s7, %s714_s25 }
  0x2f   : > { %v313_v3 = vld [vmem:[%s304_s22] sm:$0xff]  ;;  %v314_v4 = vld [vmem:[%s304_s22 + $0x8] sm:$0xff] }
  0x30   : > { %v315_v6 = vpack.c.bf16 %v314_v4, %v313_v3  ;;  %772 = vmatpush3.bf16.msra.mxu0 %v851_v2  ;;  %780 = vmatpush3.bf16.msra.mxu1 %v853_v7  ;;  %v715_v19 = vld [vmem:[%s1110_s2] ss:$0 sm:$0xff]  ;;  %v866_v30 = vld [vmem:[%s1113_s5 + $0x8] sm:$0xff]  }
  0x31   : > { %797 = vmatprep.subr.bf16.mxu0 %v940_v0  ;;  %781 = vmatprep.subr.bf16.mxu1 %v940_v0  ;;  %v867_v31 = vld [vmem:[%s1113_s5] sm:$0xff]  }
  0x32   : > { %v719_v32 = vld [vmem:[%s1112_s4] ss:$0 sm:$0xff] }
  0x33   : > { %774 = vmatmul.mubr.msk.bf16.vlgmr.msra.gmra.mxu0 %vm339_vm1, %v315_v6  ;;  %v728_v43 = vld [vmem:[%s1114_s6] ss:$0 sm:$0xff] }
  0x34   : > { %813 = vmatprep.mubr.msk.bf16.mxu0 %vm941_vm0, %v940_v0  ;;  %782 = vmatpush3.bf16.msra.mxu1 %v854_v8 }
  0x35   : > { %783 = vmatprep.subr.bf16.mxu1 %v940_v0  ;;  %798 = vmatpush3.bf16.msra.mxu0 %v860_v14 }
  0x36   : > { %799 = vmatprep.subr.bf16.mxu0 %v940_v0 }
  0x38   : > { %784 = vmatpush3.bf16.msra.mxu1 %v855_v9 }
  0x39   : > { %785 = vmatprep.subr.bf16.mxu1 %v940_v0  ;;  %800 = vmatpush3.bf16.msra.mxu0 %v861_v15 }
  0x3a   : > { %801 = vmatprep.subr.bf16.mxu0 %v940_v0 }
  0x3c   : > { %786 = vmatpush3.bf16.msra.mxu1 %v856_v10 }
  0x3d   : > { %787 = vmatprep.subr.bf16.mxu1 %v940_v0  ;;  %802 = vmatpush3.bf16.msra.mxu0 %v862_v16 }
  0x3e   : > { %803 = vmatprep.subr.bf16.mxu0 %v940_v0 }
  0x40   : > { %788 = vmatpush3.bf16.msra.mxu1 %v857_v11 }
  0x41   : > { %789 = vmatprep.subr.bf16.mxu1 %v940_v0  ;;  %804 = vmatpush3.bf16.msra.mxu0 %v863_v17 }
  0x42   : > { %805 = vmatprep.subr.bf16.mxu0 %v940_v0 }
  0x44   : > { %790 = vmatpush3.bf16.msra.mxu1 %v858_v12 }
  0x45   : > { %791 = vmatprep.subr.bf16.mxu1 %v940_v0  ;;  %806 = vmatpush3.bf16.msra.mxu0 %v864_v18 }
  0x46   : > { %807 = vmatprep.subr.bf16.mxu0 %v940_v0 }
  0x48   : > { %792 = vmatpush3.bf16.msra.mxu1 %v859_v13 }
  0x49   : > { %808 = vmatpush3.bf16.msra.mxu0 %v865_v29 }
  0x4a   : > { %809 = vmatprep.subr.bf16.mxu0 %v940_v0 }
  0x4d   : > { %810 = vmatpush3.bf16.msra.mxu0 %v866_v30 }
  0x4e   : > { %811 = vmatprep.subr.bf16.mxu0 %v940_v0 }
  0x51   : > { %812 = vmatpush3.bf16.msra.mxu0 %v867_v31 }
  0xf3   : > { %v377_v20 = vpop.f32.mrf.mxu0 }
  0xf4   : > { %v378_v22 = vadd.f32 %v715_v19, %v377_v20 }
  0xf5   : > { %v775_v21 = vpop.f32.mrf.mxu0 }
  0xf6   : > { %v384_v26 = vmax.f32 %v378_v22, 0.0 }
  0xf7   : > { %v380_v23 = vpop.f32.mrf.mxu0 }
  0xf8   : > { %v381_v24 = vadd.f32 %v715_v19, %v380_v23 }
  0xf9   : > { %v776_v25 = vpop.f32.mrf.mxu0 }
  0xfa   : > { %v385_v27 = vmax.f32 %v381_v24, 0.0 }
  0xfc   : > { %v386_v28 = vpack.c.bf16 %v385_v27, %v384_v26 }
  0xfe   : > { %794 = vmatmul.mubr.bf16.vlgmr.msra.gmra.mxu1 %v386_v28 }
 0x1be   : > { %v492_v33 = vpop.f32.mrf.mxu1 }
 0x1bf   : > { %v493_v35 = vadd.f32 %v719_v32, %v492_v33 }
 0x1c0   : > { %v795_v34 = vpop.f32.mrf.mxu1 }
 0x1c1   : > { %v499_v39 = vmax.f32 %v493_v35, 0.0 }
 0x1c2   : > { %v495_v36 = vpop.f32.mrf.mxu1 }
 0x1c3   : > { %v496_v37 = vadd.f32 %v719_v32, %v495_v36 }
 0x1c4   : > { %v796_v38 = vpop.f32.mrf.mxu1 }
 0x1c5   : > { %v500_v40 = vmax.f32 %v496_v37, 0.0 }
 0x1c7   : > { %v501_v41 = vpack.c.bf16 %v500_v40, %v499_v39 }
 0x1c9   : > { %814 = vmatmul.mubr.bf16.vlgmr.msra.gmra.mxu0 %v501_v41 }
 0x289   : > { %v607_v42 = vpop.f32.mrf.mxu0 }
 0x28a   : > { %v608_v46 = vadd.f32 %v728_v43, %v607_v42 }
 0x28b   : > { %v815_v44 = vpop.f32.mrf.mxu0 }
 0x28d   : > { %v610_v45 = vpop.f32.mrf.mxu0 }
 0x28e   : > { %v611_v47 = vadd.f32 %v728_v43, %v610_v45 }
 0x28f   : > { %v816_v48 = vpop.f32.mrf.mxu0 }
 0x290   : > { %v746_v49 = vpack.c.bf16 %v611_v47, %v608_v46 }
 0x292   : > { %747 = vst [vmem:[%s310_s28] sm:$0xff] %v746_v49  }
 0x293 PF: > { %s19_s24 = sadd.s32 1, %s934_s24  }
 0x294   : > { %p16_p3 = scmp.ge.s32.totalorder %s19_s24, 4  }
 0x296   :  { %18 = sbr.rel (!%p16_p3) target bundleno = 2 (0x2), region = 87 }
 0x29b   :  { %646 = vsyncpa [#allocation3], 1 }
 0x29c   :  { %648 = vsyncpa [#allocation3 + $0x1], 1 }
 0x29d   :  { %649 = vsyncpa [#allocation5], 1 }

</bundles_post_ra>
